<compile_context>
chip_gen: v7x
topology: tpu7x:2x2x1
jax: 0.10.0
libtpu: 0.0.40
codegen_flags: <defaults>
</compile_context>

<pallas_src>
import functools

import jax
import jax.numpy as jnp
from jax.experimental import pallas as pl
from jax.experimental.pallas import tpu as pltpu

_LANE = 128
_SUBLANE = 8


def _round_up(a, b):
    return ((a + b - 1) // b) * b


def _vmem_capacity_bytes():
    try:
        return int(pltpu.get_tpu_info().vmem_capacity_bytes)
    except Exception:
        return 64 * 1024 * 1024  # conservative: v7x per-TensorCore VMEM


def _head_kernel(x_ref, w_ref, b_ref, o_ref, *, scaled, non_linearity,
                 d_out, d_core):
    # x_ref: (TM, D_in)   row tile of the flattened input
    # w_ref: (D_in, W)    weight tile (W == d_core for un-scaled heads;
    #                     W == d_core + 128 for the scaled head, where the
    #                     last 128 lanes hold the replicated |scale| column)
    # b_ref: (1, W)       matching bias tile
    # o_ref: (TM, n_out)  exact (un-padded) output tile
    y = jnp.dot(x_ref[...], w_ref[...], preferred_element_type=jnp.float32)
    y = y + b_ref[...]                          # (1, W) broadcast over rows

    core = y if d_core == y.shape[1] else y[:, :d_core]

    if non_linearity == "softmax":
        if d_core != d_out:
            # Zero-weight pad lanes must not take part in the softmax.
            lane = jax.lax.broadcasted_iota(jnp.int32, core.shape, 1)
            core = jnp.where(lane < d_out, core, -jnp.inf)
        m = jnp.max(core, axis=-1, keepdims=True)
        e = jnp.exp(core - m)
        s = jnp.sum(e, axis=-1, keepdims=True)
        # Keeps the divide off the VALU; approx=True is available when ~1e-4
        # relative error is acceptable.
        out = e * pl.reciprocal(s, approx=False)
    elif non_linearity == "exp":
        out = jnp.exp(core)
    elif non_linearity == "abs":
        out = jnp.abs(core)
    else:
        raise ValueError(f"unknown non_linearity: {non_linearity}")

    if scaled:
        scale = jnp.abs(y[:, d_core:])          # (TM, 128), replicated lanes
        if scale.shape[1] == out.shape[1]:
            out = out * scale                   # no lane broadcast needed
        else:
            out = out * scale[:, :1]            # d_out > 128: broadcast lane 0

    n_store = o_ref.shape[-1]
    if out.shape[1] != n_store:
        out = out[:, :n_store]
    o_ref[...] = out.astype(o_ref.dtype)


def head_forward(x, weight, bias, *, scaled=False, non_linearity="exp",
                 tn_max=512, col_tile_bytes=None):
    """x: [B, T, D_in]; weight: [D_in, D_tot] (transposed vs torch Linear);
    bias: [D_tot].  Returns [B, T, output_dim], output_dim = D_tot - scaled.
    """
    if non_linearity not in ("exp", "abs", "softmax"):
        raise ValueError(f"unknown non_linearity: {non_linearity}")

    B, T, d_in = x.shape
    d_tot = weight.shape[1]
    d_out = d_tot - int(scaled)
    M = B * T

    x_isz = x.dtype.itemsize
    w_isz = weight.dtype.itemsize
    o_isz = x.dtype.itemsize

    cap = _vmem_capacity_bytes()
    budget = max(16 * 1024 * 1024, cap - 8 * 1024 * 1024)

    # ---- packed weight / bias (only the scaled head needs a repack) -------
    if scaled:
        d_core = _round_up(d_out, _LANE)        # lane-aligned core block
        W = d_core + _LANE                      # + replicated |scale| block
        w_p = jnp.zeros((d_in, W), dtype=weight.dtype)
        w_p = w_p.at[:, :d_out].set(weight[:, :d_out])
        w_p = w_p.at[:, d_core:].set(
            jnp.broadcast_to(weight[:, d_out:d_out + 1], (d_in, _LANE)))
        b_p = jnp.zeros((W,), dtype=bias.dtype)
        b_p = b_p.at[:d_out].set(bias[:d_out]).at[d_core:].set(bias[d_out])
        b_p = b_p.reshape(1, W)
    else:
        d_core = d_out
        W = d_out
        w_p = weight
        b_p = bias.reshape(1, W)

    # ---- row tiling (generation aware; >=2 steps for the 2 v7x TCs) -------
    pack = max(_SUBLANE, 32 // x_isz)           # 8 f32 / 16 bf16 / 32 int8
    tm_cap = 1024 if cap >= 100 * 1024 * 1024 else 512
    n_steps = max(2, pl.cdiv(M, tm_cap))
    tm = max(pack, min(tm_cap, _round_up(pl.cdiv(M, n_steps), pack)))

    def vmem_need(tm_, w_cols, out_cols, n_const_buf):
        x_buf = 2 * tm_ * _round_up(d_in, _LANE) * x_isz
        w_buf = (n_const_buf * _round_up(d_in, _SUBLANE)
                 * _round_up(w_cols, _LANE) * w_isz)
        bias_buf = n_const_buf * _SUBLANE * _round_up(w_cols, _LANE) * w_isz
        o_buf = 2 * tm_ * _round_up(out_cols, _LANE) * o_isz
        y_tmp = (tm_ * _round_up(w_cols, _LANE) * 4
                 + tm_ * _round_up(out_cols, _LANE) * 4)   # f32 intermediates
        return x_buf + w_buf + bias_buf + o_buf + y_tmp

    # ---- optional column tiling for large un-scaled elementwise heads -----
    w_resident = _round_up(d_in, _SUBLANE) * _round_up(W, _LANE) * w_isz
    if col_tile_bytes is None:
        col_tile_bytes = budget // 4
    use_col_tiles = ((not scaled) and non_linearity != "softmax"
                     and d_out > _LANE and w_resident > col_tile_bytes)

    if use_col_tiles:
        tn = max(_LANE, _round_up(min(tn_max, d_out), _LANE))
        while tm > pack and vmem_need(tm, tn, tn, 2) > budget:
            tm = max(pack, _round_up(tm // 2, pack))
    else:
        tn = None
        while tm > pack and vmem_need(tm, W, d_out, 1) > budget:
            tm = max(pack, _round_up(tm // 2, pack))

    def build(single_buffer_consts):
        if use_col_tiles:
            grid = (pl.cdiv(M, tm), pl.cdiv(d_out, tn))
            in_specs = [
                pl.BlockSpec((tm, d_in), lambda i, j: (i, 0)),
                pl.BlockSpec((d_in, tn), lambda i, j: (0, j)),
                pl.BlockSpec((1, tn), lambda i, j: (0, j)),
            ]
            out_specs = pl.BlockSpec((tm, tn), lambda i, j: (i, j))
            sem = ("parallel", "parallel")
            need = vmem_need(tm, tn, tn, 2)
            kern = functools.partial(
                _head_kernel, scaled=False, non_linearity=non_linearity,
                d_out=tn, d_core=tn)
        else:
            if single_buffer_consts:
                # Constant blocks (index_map == (0, 0) for every step):
                # double-buffering buys nothing, halve their VMEM footprint.
                const_kwargs = dict(pipeline_mode=pl.Buffered(buffer_count=1))
            else:
                const_kwargs = {}
            grid = (pl.cdiv(M, tm),)
            in_specs = [
                pl.BlockSpec((tm, d_in), lambda i: (i, 0)),
                pl.BlockSpec((d_in, W), lambda i: (0, 0), **const_kwargs),
                pl.BlockSpec((1, W), lambda i: (0, 0), **const_kwargs),
            ]
            out_specs = pl.BlockSpec((tm, d_out), lambda i: (i, 0))
            sem = ("parallel",)
            need = vmem_need(tm, W, d_out, 1 if single_buffer_consts else 2)
            kern = functools.partial(
                _head_kernel, scaled=scaled, non_linearity=non_linearity,
                d_out=d_out, d_core=d_core)

        vmem_limit = int(min(budget,
                             max(16 * 1024 * 1024,
                                 int(need * 1.25) + 2 * 1024 * 1024)))
        cost = pl.CostEstimate(
            flops=2 * M * d_in * W,
            transcendentals=(M * d_core
                             if non_linearity in ("exp", "softmax") else 0),
            bytes_accessed=(M * d_in * x_isz + d_in * W * w_isz
                            + W * w_isz + M * d_out * o_isz),
        )
        return pl.pallas_call(
            kern,
            out_shape=jax.ShapeDtypeStruct((M, d_out), x.dtype),
            grid_spec=pltpu.PrefetchScalarGridSpec(
                num_scalar_prefetch=0,
                grid=grid,
                in_specs=in_specs,
                out_specs=out_specs),
            compiler_params=pltpu.CompilerParams(
                dimension_semantics=sem,
                vmem_limit_bytes=vmem_limit),
            cost_estimate=cost,
        )

    x2 = x.reshape(M, d_in)                     # metadata-only, no HBM copy
    try:
        out2 = build(True)(x2, w_p, b_p)
    except Exception:
        # Installed jax may not support pl.Buffered(1) on pallas_call specs;
        # fall back to default (double) buffering of the constant blocks.
        out2 = build(False)(x2, w_p, b_p)
    return out2.reshape(B, T, d_out)


def head_reference(x, weight, bias, *, scaled=False, non_linearity="exp"):
    y = jnp.einsum("btd,df->btf", x, weight) + bias
    nl = {"exp": jnp.exp, "abs": jnp.abs,
          "softmax": lambda v: jax.nn.softmax(v, axis=-1)}[non_linearity]
    if scaled:
        return nl(y[:, :, :-1]) * jnp.abs(y[:, :, -1:])
    return nl(y)


if __name__ == "__main__":
    # Small shapes consistent with the module's 3-D input convention.
    B, T, D_IN, D_OUT = 2, 8, 32, 16

    key = jax.random.PRNGKey(0)
    kx, kw0, kb0, kw1, kb1, kw2, kb2 = jax.random.split(key, 7)

    x = jax.random.normal(kx, (B, T, D_IN), dtype=jnp.float32)

    w0 = jax.random.normal(kw0, (D_IN, D_OUT), dtype=jnp.float32) * 0.1
    b0 = jax.random.normal(kb0, (D_OUT,), dtype=jnp.float32) * 0.1
    w1 = jax.random.normal(kw1, (D_IN, D_OUT + 1), dtype=jnp.float32) * 0.1
    b1 = jax.random.normal(kb1, (D_OUT + 1,), dtype=jnp.float32) * 0.1

    def check(out, ref, shape, tol=1e-5):
        assert out.shape == shape, (out.shape, shape)
        err = float(jnp.max(jnp.abs(out - ref)))
        assert jnp.allclose(out, ref, rtol=tol, atol=tol), err

    # --- Config 1: module defaults (scaled=False, non_linearity='exp') ----
    out = jax.block_until_ready(
        head_forward(x, w0, b0, scaled=False, non_linearity="exp"))
    check(out, head_reference(x, w0, b0, scaled=False, non_linearity="exp"),
          (B, T, D_OUT))

    # --- Config 2: scaled head (extra column used as |scale|) -------------
    out = jax.block_until_ready(
        head_forward(x, w1, b1, scaled=True, non_linearity="exp"))
    check(out, head_reference(x, w1, b1, scaled=True, non_linearity="exp"),
          (B, T, D_OUT))

    # --- Config 3: softmax head -------------------------------------------
    out = jax.block_until_ready(
        head_forward(x, w0, b0, scaled=False, non_linearity="softmax"))
    check(out, head_reference(x, w0, b0, scaled=False, non_linearity="softmax"),
          (B, T, D_OUT))

    # --- Config 4: scaled + abs --------------------------------------------
    out = jax.block_until_ready(
        head_forward(x, w1, b1, scaled=True, non_linearity="abs"))
    check(out, head_reference(x, w1, b1, scaled=True, non_linearity="abs"),
          (B, T, D_OUT))

    # --- Config 5: scaled + softmax (exercises padded-lane -inf masking) ----
    out = jax.block_until_ready(
        head_forward(x, w1, b1, scaled=True, non_linearity="softmax"))
    check(out, head_reference(x, w1, b1, scaled=True, non_linearity="softmax"),
          (B, T, D_OUT))

    # --- Config 6: forced column-tiled path (wider un-scaled exp head) ------
    D_BIG = 384
    w2 = jax.random.normal(kw2, (D_IN, D_BIG), dtype=jnp.float32) * 0.1
    b2 = jax.random.normal(kb2, (D_BIG,), dtype=jnp.float32) * 0.1
    out = jax.block_until_ready(
        head_forward(x, w2, b2, scaled=False, non_linearity="exp",
                     tn_max=128, col_tile_bytes=0))
    check(out, head_reference(x, w2, b2, scaled=False, non_linearity="exp"),
          (B, T, D_BIG))

    print("KERNEL_OK")
</pallas_src>

<mosaic_0001>
module attributes {stable_mosaic.version = 11 : i64} {
  func.func @_head_kernel(%arg0: i32, %arg1: memref<8x32xf32, #tpu.memory_space<vmem>>, %arg2: memref<32x16xf32, #tpu.memory_space<vmem>>, %arg3: memref<1x16xf32, #tpu.memory_space<vmem>>, %arg4: memref<8x16xf32, #tpu.memory_space<vmem>>) attributes {dimension_semantics = [#tpu.dimension_semantics<parallel>], iteration_bounds = array<i64: 2>, scalar_prefetch = 0 : i64, scratch_operands = 0 : i64, tpu.core_type = #tpu.core_type<tc>, window_params = [{transform_indices = @transform_0, window_bounds = array<i64: 8, 32>}, {pipeline_mode = #tpu.pipeline_mode<synchronous>, transform_indices = @transform_1, window_bounds = array<i64: 32, 16>}, {pipeline_mode = #tpu.pipeline_mode<synchronous>, transform_indices = @transform_2, window_bounds = array<i64: 1, 16>}, {transform_indices = @transform_3, window_bounds = array<i64: 8, 16>}]} {
    %c0 = arith.constant 0 : index
    %c0_0 = arith.constant 0 : index
    %0 = vector.load %arg1[%c0, %c0_0] : memref<8x32xf32, #tpu.memory_space<vmem>>, vector<8x32xf32>
    %c0_1 = arith.constant 0 : index
    %c0_2 = arith.constant 0 : index
    %1 = vector.load %arg2[%c0_1, %c0_2] : memref<32x16xf32, #tpu.memory_space<vmem>>, vector<32x16xf32>
    %cst = arith.constant dense<0.000000e+00> : vector<8x16xf32>
    %2 = tpu.matmul %0, %1, %cst {dimension_numbers = #tpu.dot_dimension_numbers<[1], [0], [0], [1], [0, 0, 1, 1], [], []>} : vector<8x32xf32>, vector<32x16xf32>, vector<8x16xf32> -> vector<8x16xf32>
    %c0_3 = arith.constant 0 : index
    %c0_4 = arith.constant 0 : index
    %3 = vector.load %arg3[%c0_3, %c0_4] : memref<1x16xf32, #tpu.memory_space<vmem>>, vector<1x16xf32>
    %4 = vector.broadcast %3 : vector<1x16xf32> to vector<8x16xf32>
    %5 = arith.addf %2, %4 : vector<8x16xf32>
    %6 = math.exp %5 : vector<8x16xf32>
    %c0_5 = arith.constant 0 : index
    %c0_6 = arith.constant 0 : index
    %7 = vector.load %arg4[%c0_5, %c0_6] : memref<8x16xf32, #tpu.memory_space<vmem>>, vector<8x16xf32>
    tpu.vector_store %arg4[%c0_5, %c0_6], %6 {strides = array<i32>} : memref<8x16xf32, #tpu.memory_space<vmem>>, vector<8x16xf32>,
    return
  }
  func.func @transform_0(%arg0: i32) -> (i32, i32) {
    %c0_i32 = arith.constant 0 : i32
    %c0_i32_0 = arith.constant 0 : i32
    return %arg0, %c0_i32 : i32, i32
  }
  func.func @transform_1(%arg0: i32) -> (i32, i32) {
    %c0_i32 = arith.constant 0 : i32
    %c0_i32_0 = arith.constant 0 : i32
    %c0_i32_1 = arith.constant 0 : i32
    return %c0_i32, %c0_i32_0 : i32, i32
  }
  func.func @transform_2(%arg0: i32) -> (i32, i32) {
    %c0_i32 = arith.constant 0 : i32
    %c0_i32_0 = arith.constant 0 : i32
    %c0_i32_1 = arith.constant 0 : i32
    return %c0_i32, %c0_i32_0 : i32, i32
  }
  func.func @transform_3(%arg0: i32) -> (i32, i32) {
    %c0_i32 = arith.constant 0 : i32
    %c0_i32_0 = arith.constant 0 : i32
    return %arg0, %c0_i32 : i32, i32
  }
}

module attributes {stable_mosaic.version = 11 : i64} {
  func.func @_head_kernel(%arg0: i32, %arg1: memref<8x32xf32, #tpu.memory_space<vmem>>, %arg2: memref<32x16xf32, #tpu.memory_space<vmem>>, %arg3: memref<1x16xf32, #tpu.memory_space<vmem>>, %arg4: memref<8x16xf32, #tpu.memory_space<vmem>>) attributes {dimension_semantics = [#tpu.dimension_semantics<parallel>], iteration_bounds = array<i64: 2>, scalar_prefetch = 0 : i64, scratch_operands = 0 : i64, tpu.core_type = #tpu.core_type<tc>, window_params = [{transform_indices = @transform_0, window_bounds = array<i64: 8, 32>}, {pipeline_mode = #tpu.pipeline_mode<synchronous>, transform_indices = @transform_1, window_bounds = array<i64: 32, 16>}, {pipeline_mode = #tpu.pipeline_mode<synchronous>, transform_indices = @transform_2, window_bounds = array<i64: 1, 16>}, {transform_indices = @transform_3, window_bounds = array<i64: 8, 16>}]} {
    %c0 = arith.constant 0 : index
    %c0_0 = arith.constant 0 : index
    %0 = vector.load %arg1[%c0, %c0_0] : memref<8x32xf32, #tpu.memory_space<vmem>>, vector<8x32xf32>
    %c0_1 = arith.constant 0 : index
    %c0_2 = arith.constant 0 : index
    %1 = vector.load %arg2[%c0_1, %c0_2] : memref<32x16xf32, #tpu.memory_space<vmem>>, vector<32x16xf32>
    %cst = arith.constant dense<0.000000e+00> : vector<8x16xf32>
    %2 = tpu.matmul %0, %1, %cst {dimension_numbers = #tpu.dot_dimension_numbers<[1], [0], [0], [1], [0, 0, 1, 1], [], []>} : vector<8x32xf32>, vector<32x16xf32>, vector<8x16xf32> -> vector<8x16xf32>
    %c0_3 = arith.constant 0 : index
    %c0_4 = arith.constant 0 : index
    %3 = vector.load %arg3[%c0_3, %c0_4] : memref<1x16xf32, #tpu.memory_space<vmem>>, vector<1x16xf32>
    %4 = vector.broadcast %3 : vector<1x16xf32> to vector<8x16xf32>
    %5 = arith.addf %2, %4 : vector<8x16xf32>
    %6 = math.exp %5 : vector<8x16xf32>
    %c0_5 = arith.constant 0 : index
    %c0_6 = arith.constant 0 : index
    %7 = vector.load %arg4[%c0_5, %c0_6] : memref<8x16xf32, #tpu.memory_space<vmem>>, vector<8x16xf32>
    tpu.vector_store %arg4[%c0_5, %c0_6], %6 {strides = array<i32>} : memref<8x16xf32, #tpu.memory_space<vmem>>, vector<8x16xf32>,
    return
  }
  func.func @transform_0(%arg0: i32) -> (i32, i32) {
    %c0_i32 = arith.constant 0 : i32
    %c0_i32_0 = arith.constant 0 : i32
    return %arg0, %c0_i32 : i32, i32
  }
  func.func @transform_1(%arg0: i32) -> (i32, i32) {
    %c0_i32 = arith.constant 0 : i32
    %c0_i32_0 = arith.constant 0 : i32
    %c0_i32_1 = arith.constant 0 : i32
    return %c0_i32, %c0_i32_0 : i32, i32
  }
  func.func @transform_2(%arg0: i32) -> (i32, i32) {
    %c0_i32 = arith.constant 0 : i32
    %c0_i32_0 = arith.constant 0 : i32
    %c0_i32_1 = arith.constant 0 : i32
    return %c0_i32, %c0_i32_0 : i32, i32
  }
  func.func @transform_3(%arg0: i32) -> (i32, i32) {
    %c0_i32 = arith.constant 0 : i32
    %c0_i32_0 = arith.constant 0 : i32
    return %arg0, %c0_i32 : i32, i32
  }
}

</mosaic_0001>

<bundles_post_ra>
// kernel: tpu_custom_call.1
= control target key start
LH: loop header
LB: loop body
LE: loop exit
PB: predicated region body
PF: predicated region fallthrough
CT: control target
= control target key end

     0   :  { %8 = vsyncpa [#allocation3], 0  ;;  %s610_s0 = inlined_call_operand.vmem [shape: f32[16,32], index: 0, kind: input, shape index: {}]   ;;  %s611_s1 = inlined_call_operand.vmem [shape: f32[32,16], index: 1, kind: input, shape index: {}]   ;;  %s612_s2 = inlined_call_operand.vmem [shape: f32[1,16], index: 2, kind: input, shape index: {}]   ;;  %s613_s3 = inlined_call_operand.hbm [shape: f32[16,16], index: 3, kind: output, shape index: {}]  }
   0x1   :  { %10 = vsyncpa [#allocation3 + $0x1], 0  ;;  %s495_s12 = smov 0   ;;  %s497_s13 = smov 0  }
   0x2   :  { %s499_s14 = smov 0   ;;  %s501_s15 = smov 0  }
   0x3 LB: > { %s516_s16 = sadd.s32 4294967295, %s469_s15   ;;  %s329_s17 = sadd.s32 4294967294, %s469_s15   ;;  %s469_s15 = sphi %s501_s15, %s619_s15   ;;  %s465_s14 = sphi %s499_s14, %s618_s14   ;;  %s461_s13 = sphi %s497_s13, %s617_s13   ;;  %s457_s12 = sphi %s495_s12, %s616_s12  }
   0x4   : > { %s520_s18 = sadd.s32 1, %s469_s15   ;;  %s91_s19 = sadd.s32 1, %s465_s14 }
   0x5   : > { %s88_s20 = ssub.s32 %s469_s15, %s520_s18  ;;  %p101_p0 = scmp.ne.s32.totalorder %s465_s14, %s461_s13 }
   0x6   : > { %p89_p1 = scmp.eq.s32.totalorder %s88_s20, 0  ;;  %p102_p2 = scmp.eq.s32.totalorder %s516_s16, 1 }
   0x7   : > { %p107_p3 = scmp.ne.s32.totalorder %s461_s13, %s457_s12  ;;  %p108_p4 = scmp.eq.s32.totalorder %s329_s17, 1 }
   0x8   : > { %s531_s21 = scalar_select %p89_p1, %s465_s14, %s91_s19  }
   0x9   : > { %p533_p5 = por %p102_p2, %p101_p0  ;;  %p537_p6 = por %p108_p4, %p107_p3 }
   0xa   : > { %p332_p7 = scmp.ge.s32.totalorder %s469_s15, 1  ;;  %p139_p8 = scmp.lt.s32.totalorder %s469_s15, 3 }
   0xc   : > { %p140_p9 = pnand %p332_p7, %p139_p8 }
   0xd   : > { %v167_v0 = vld [vmem:[%s611_s1] sm:$0xff] (!%p140_p9)  ;;  %v168_v1 = vld [vmem:[%s611_s1 + $0x8] sm:$0xff] (!%p140_p9)  ;;  %v169_v2 = vld [vmem:[%s611_s1 + $0x10] sm:$0xff] (!%p140_p9)  ;;  %v471_v3 = vmov (!%p140_p9), 0.0|0.0   ;;  %vm472_vm0 = vmmov (!%p140_p9), 0   ;;  %v473_v6 = vmov (!%p140_p9), 0.0  }
   0xe   : > { %143 = sbr.rel (%p140_p9) target bundleno = 267 (0x10b), region = 32  ;;  %357 = vmatprep.subr.bf16.mxu0 (!%p140_p9), %v471_v3  ;;  %v358_v4 = vpack.c.bf16 (!%p140_p9), %v168_v1, %v167_v0  ;;  %v170_v5 = vld [vmem:[%s611_s1 + $0x18] sm:$0xff] (!%p140_p9)  ;;  %354 = vmatprep.mubr.msk.f32.mxu0 (!%p140_p9), %vm472_vm0, %v473_v6  ;;  %p162_p10 = scmp.lt.s32.totalorder (!%p140_p9), %s516_s16, 1  ;;  %vm178_vm1 = vcmask (!%p140_p9), 261120   ;;  %v335_v9 = vld [vmem:[%s612_s2] ss:$0 sm:$0xff] (!%p140_p9) }
   0xf   : > { %v361_v7 = vpack.c.bf16 (!%p140_p9), %v170_v5, %v169_v2  ;;  %s159_s17 = sand.u32 (!%p140_p9), 1, %s461_s13   ;;  %s338_s20 = sshll.u32 (!%p140_p9), %s516_s16, 7  ;;  %vm254_vm2 = vcmask (!%p140_p9), 130048  }
  0x10   : > { %359 = vmatpush3.bf16.msra.mxu0 (!%p140_p9), %v358_v4  ;;  %s333_s19 = sshll.u32 (!%p140_p9), %s159_s17, 3  ;;  %s568_s28 = scalar_lea.hbm (!%p140_p9), %s613_s3, %s338_s20 }
  0x11   : > { %360 = vmatprep.subr.bf16.mxu0 (!%p140_p9), %v471_v3  ;;  %s161_s24 = scalar_lea.vmem (!%p140_p9), [#allocation2], %s333_s19  ;;  %s257_s29 = scalar_lea.sflag (!%p140_p9), [#allocation3], %s159_s17 }
  0x12   : > { %s270_s25 = sshll.u32 (!%p140_p9), %s161_s24, 4  ;;  %s570_s25 = int_to_ptr.vmem [resolvable:$true] %s270_s25 }
  0x13   : > { %s407_s30 = scalar_lea.vmem (!%p140_p9), %s570_s25, 128 }
  0x14   : > { %362 = vmatpush3.bf16.msra.mxu0 (!%p140_p9), %v361_v7  ;;  %p408_p11 = scmp.ne.s32.totalorder (!%p140_p9), %s570_s25, %s407_s30 }
  0x15   : > { %s163_s5 = scalar_select %p162_p10, %s516_s16, 1 }
  0x16   : > { %p409_p12 = pnand %p408_p11, %p533_p5  ;;  %s474_s16 = smov [#allocation2]  }
  0x17   : > { %s334_s6 = sshll.u32 %s163_s5, 3  ;;  %s411_s4 = sshll.u32 %s474_s16, 4  ;;  %s412_s4 = int_to_ptr.vmem [resolvable:$false] %s411_s4 }
  0x18   : > { %s165_s9 = scalar_lea.vmem %s610_s0, %s334_s6  ;;  %p410_p13 = pneg %p409_p12 }
  0x19   : > { %v166_v8 = vld [vmem:[%s165_s9] sm:$0xff]  ;;  %s413_s5 = scalar_lea.vmem %s412_s4, 256  ;;  %p414_p0 = scmp.lt.s32.totalorder %s570_s25, %s412_s4 }
  0x1a   : > { %355 = vmatmul.mubr.msk.f32.vlgmr.msra.gmra.mrb[0].mxu0 %vm178_vm1, %v166_v8  ;;  %p415_p1 = scmp.lt.s32.totalorder %s413_s5, %s407_s30 }
  0x1c   : > { %p416_p2 = por %p415_p1, %p414_p0 }
  0x1e   : > { %p417_p3 = pnand %p416_p2, %p410_p13 }
  0xed   : > { %v248_v10 = vpop.f32.mrb[0].mxu0 }
  0xee   : > { %v249_v11 = vadd.f32 %v335_v9, %v248_v10  ;;  %v356_v12 = vpop.f32.mrb[1].mxu0 }
  0xf0   : > { %v252_v13 = vmul.f32 1.442695, %v249_v11 }
  0xf2   : > { %405 = vpow2.f32 %v252_v13 }
  0xfc   : > { %v406_v14 = vpop.eup %405 }
  0xfd   : > { %255 = vst.msk [vmem:[%s161_s24] sm:$0xff] %vm254_vm2, %v406_v14 }
  0xfe   : > { %420 = shalt.err (!%p417_p3)
}
  0xff   : > { %s421_s6 = scalar_lea.hbm %s568_s28, 128  ;;  %s425_s9 = scalar_lea.hbm %s613_s3, 256 }
 0x100   : > { %p422_p4 = scmp.ne.s32.totalorder %s568_s28, %s421_s6  ;;  %p426_p9 = scmp.lt.u32.totalorder %s568_s28, %s613_s3 }
 0x101   : > { %p427_p10 = scmp.lt.u32.totalorder %s425_s9, %s421_s6  ;;  %p429_p12 = scmp.lt.u32.totalorder %s421_s6, %s568_s28 }
 0x102   : > { %p423_p7 = pnand %p422_p4, %p533_p5 }
 0x103   : > { %p428_p11 = por %p427_p10, %p426_p9 }
 0x104   : > { %p424_p8 = pneg %p423_p7 }
 0x105   : > { %p430_p13 = por %p429_p12, %p428_p11 }
 0x107   : > { %p431_p0 = pnand %p430_p13, %p424_p8 }
 0x109   : > { %434 = shalt.err (!%p431_p0)
}
 0x10a   : > { %363 = dma.vmem_to_hbm [thread:$0]  (%p533_p5), %s570_s25, 128, %s568_s28, %s257_s29  }
 0x10b PF: > { %p369_p1 = scmp.ge.s32.totalorder %s469_s15, 2  ;;  %s282_s17 = sand.u32 1, %s457_s12  }
 0x10c   : > { %s283_s19 = scalar_lea.sflag [#allocation3], %s282_s17 }
 0x10d   : > { %p366_p2 = pnand %p369_p1, %p537_p6 }
 0x10f   : > { %452 = dma.done.wait (!%p366_p2), %s283_s19, 128  }
 0x110   : > { %454 = vsyncadd (!%p366_p2), %s283_s19, 4294967168  ;;  %p13_p3 = scmp.ge.s32.totalorder %s520_s18, 4   ;;  %s616_s12 = smov %s461_s13 }
 0x111   : > { %s617_s13 = smov %s465_s14  ;;  %s618_s14 = smov %s531_s21 }
 0x112   : > { %s619_s15 = smov %s520_s18  ;;  %15 = sbr.rel (!%p13_p3) target bundleno = 3 (0x3), region = 67 }
 0x119   :  { %288 = vsyncpa [#allocation3], 1 }
 0x11a   :  { %290 = vsyncpa [#allocation3 + $0x1], 1 }

// kernel: tpu_custom_call.1
= control target key start
LH: loop header
LB: loop body
LE: loop exit
PB: predicated region body
PF: predicated region fallthrough
CT: control target
= control target key end

     0   :  { %8 = vsyncpa [#allocation3], 0  ;;  %s610_s0 = inlined_call_operand.vmem [shape: f32[16,32], index: 0, kind: input, shape index: {}]   ;;  %s611_s1 = inlined_call_operand.vmem [shape: f32[32,16], index: 1, kind: input, shape index: {}]   ;;  %s612_s2 = inlined_call_operand.vmem [shape: f32[1,16], index: 2, kind: input, shape index: {}]   ;;  %s613_s3 = inlined_call_operand.hbm [shape: f32[16,16], index: 3, kind: output, shape index: {}]  }
   0x1   :  { %10 = vsyncpa [#allocation3 + $0x1], 0  ;;  %s495_s12 = smov 0   ;;  %s497_s13 = smov 0  }
   0x2   :  { %s499_s14 = smov 0   ;;  %s501_s15 = smov 0  }
   0x3 LB: > { %s516_s16 = sadd.s32 4294967295, %s469_s15   ;;  %s329_s17 = sadd.s32 4294967294, %s469_s15   ;;  %s469_s15 = sphi %s501_s15, %s619_s15   ;;  %s465_s14 = sphi %s499_s14, %s618_s14   ;;  %s461_s13 = sphi %s497_s13, %s617_s13   ;;  %s457_s12 = sphi %s495_s12, %s616_s12  }
   0x4   : > { %s520_s18 = sadd.s32 1, %s469_s15   ;;  %s91_s19 = sadd.s32 1, %s465_s14 }
   0x5   : > { %s88_s20 = ssub.s32 %s469_s15, %s520_s18  ;;  %p101_p0 = scmp.ne.s32.totalorder %s465_s14, %s461_s13 }
   0x6   : > { %p89_p1 = scmp.eq.s32.totalorder %s88_s20, 0  ;;  %p102_p2 = scmp.eq.s32.totalorder %s516_s16, 1 }
   0x7   : > { %p107_p3 = scmp.ne.s32.totalorder %s461_s13, %s457_s12  ;;  %p108_p4 = scmp.eq.s32.totalorder %s329_s17, 1 }
   0x8   : > { %s531_s21 = scalar_select %p89_p1, %s465_s14, %s91_s19  }
   0x9   : > { %p533_p5 = por %p102_p2, %p101_p0  ;;  %p537_p6 = por %p108_p4, %p107_p3 }
   0xa   : > { %p332_p7 = scmp.ge.s32.totalorder %s469_s15, 1  ;;  %p139_p8 = scmp.lt.s32.totalorder %s469_s15, 3 }
   0xc   : > { %p140_p9 = pnand %p332_p7, %p139_p8 }
   0xd   : > { %v167_v0 = vld [vmem:[%s611_s1] sm:$0xff] (!%p140_p9)  ;;  %v168_v1 = vld [vmem:[%s611_s1 + $0x8] sm:$0xff] (!%p140_p9)  ;;  %v169_v2 = vld [vmem:[%s611_s1 + $0x10] sm:$0xff] (!%p140_p9)  ;;  %v471_v3 = vmov (!%p140_p9), 0.0|0.0   ;;  %vm472_vm0 = vmmov (!%p140_p9), 0   ;;  %v473_v6 = vmov (!%p140_p9), 0.0  }
   0xe   : > { %143 = sbr.rel (%p140_p9) target bundleno = 267 (0x10b), region = 32  ;;  %357 = vmatprep.subr.bf16.mxu0 (!%p140_p9), %v471_v3  ;;  %v358_v4 = vpack.c.bf16 (!%p140_p9), %v168_v1, %v167_v0  ;;  %v170_v5 = vld [vmem:[%s611_s1 + $0x18] sm:$0xff] (!%p140_p9)  ;;  %354 = vmatprep.mubr.msk.f32.mxu0 (!%p140_p9), %vm472_vm0, %v473_v6  ;;  %p162_p10 = scmp.lt.s32.totalorder (!%p140_p9), %s516_s16, 1  ;;  %vm178_vm1 = vcmask (!%p140_p9), 261120   ;;  %v335_v9 = vld [vmem:[%s612_s2] ss:$0 sm:$0xff] (!%p140_p9) }
   0xf   : > { %v361_v7 = vpack.c.bf16 (!%p140_p9), %v170_v5, %v169_v2  ;;  %s159_s17 = sand.u32 (!%p140_p9), 1, %s461_s13   ;;  %s338_s20 = sshll.u32 (!%p140_p9), %s516_s16, 7  ;;  %vm254_vm2 = vcmask (!%p140_p9), 130048  }
  0x10   : > { %359 = vmatpush3.bf16.msra.mxu0 (!%p140_p9), %v358_v4  ;;  %s333_s19 = sshll.u32 (!%p140_p9), %s159_s17, 3  ;;  %s568_s28 = scalar_lea.hbm (!%p140_p9), %s613_s3, %s338_s20 }
  0x11   : > { %360 = vmatprep.subr.bf16.mxu0 (!%p140_p9), %v471_v3  ;;  %s161_s24 = scalar_lea.vmem (!%p140_p9), [#allocation2], %s333_s19  ;;  %s257_s29 = scalar_lea.sflag (!%p140_p9), [#allocation3], %s159_s17 }
  0x12   : > { %s270_s25 = sshll.u32 (!%p140_p9), %s161_s24, 4  ;;  %s570_s25 = int_to_ptr.vmem [resolvable:$true] %s270_s25 }
  0x13   : > { %s407_s30 = scalar_lea.vmem (!%p140_p9), %s570_s25, 128 }
  0x14   : > { %362 = vmatpush3.bf16.msra.mxu0 (!%p140_p9), %v361_v7  ;;  %p408_p11 = scmp.ne.s32.totalorder (!%p140_p9), %s570_s25, %s407_s30 }
  0x15   : > { %s163_s5 = scalar_select %p162_p10, %s516_s16, 1 }
  0x16   : > { %p409_p12 = pnand %p408_p11, %p533_p5  ;;  %s474_s16 = smov [#allocation2]  }
  0x17   : > { %s334_s6 = sshll.u32 %s163_s5, 3  ;;  %s411_s4 = sshll.u32 %s474_s16, 4  ;;  %s412_s4 = int_to_ptr.vmem [resolvable:$false] %s411_s4 }
  0x18   : > { %s165_s9 = scalar_lea.vmem %s610_s0, %s334_s6  ;;  %p410_p13 = pneg %p409_p12 }
  0x19   : > { %v166_v8 = vld [vmem:[%s165_s9] sm:$0xff]  ;;  %s413_s5 = scalar_lea.vmem %s412_s4, 256  ;;  %p414_p0 = scmp.lt.s32.totalorder %s570_s25, %s412_s4 }
  0x1a   : > { %355 = vmatmul.mubr.msk.f32.vlgmr.msra.gmra.mrb[0].mxu0 %vm178_vm1, %v166_v8  ;;  %p415_p1 = scmp.lt.s32.totalorder %s413_s5, %s407_s30 }
  0x1c   : > { %p416_p2 = por %p415_p1, %p414_p0 }
  0x1e   : > { %p417_p3 = pnand %p416_p2, %p410_p13 }
  0xed   : > { %v248_v10 = vpop.f32.mrb[0].mxu0 }
  0xee   : > { %v249_v11 = vadd.f32 %v335_v9, %v248_v10  ;;  %v356_v12 = vpop.f32.mrb[1].mxu0 }
  0xf0   : > { %v252_v13 = vmul.f32 1.442695, %v249_v11 }
  0xf2   : > { %405 = vpow2.f32 %v252_v13 }
  0xfc   : > { %v406_v14 = vpop.eup %405 }
  0xfd   : > { %255 = vst.msk [vmem:[%s161_s24] sm:$0xff] %vm254_vm2, %v406_v14 }
  0xfe   : > { %420 = shalt.err (!%p417_p3)
}
  0xff   : > { %s421_s6 = scalar_lea.hbm %s568_s28, 128  ;;  %s425_s9 = scalar_lea.hbm %s613_s3, 256 }
 0x100   : > { %p422_p4 = scmp.ne.s32.totalorder %s568_s28, %s421_s6  ;;  %p426_p9 = scmp.lt.u32.totalorder %s568_s28, %s613_s3 }
 0x101   : > { %p427_p10 = scmp.lt.u32.totalorder %s425_s9, %s421_s6  ;;  %p429_p12 = scmp.lt.u32.totalorder %s421_s6, %s568_s28 }
 0x102   : > { %p423_p7 = pnand %p422_p4, %p533_p5 }
 0x103   : > { %p428_p11 = por %p427_p10, %p426_p9 }
 0x104   : > { %p424_p8 = pneg %p423_p7 }
 0x105   : > { %p430_p13 = por %p429_p12, %p428_p11 }
 0x107   : > { %p431_p0 = pnand %p430_p13, %p424_p8 }
 0x109   : > { %434 = shalt.err (!%p431_p0)
}
 0x10a   : > { %363 = dma.vmem_to_hbm [thread:$0]  (%p533_p5), %s570_s25, 128, %s568_s28, %s257_s29  }
 0x10b PF: > { %p369_p1 = scmp.ge.s32.totalorder %s469_s15, 2  ;;  %s282_s17 = sand.u32 1, %s457_s12  }
 0x10c   : > { %s283_s19 = scalar_lea.sflag [#allocation3], %s282_s17 }
 0x10d   : > { %p366_p2 = pnand %p369_p1, %p537_p6 }
 0x10f   : > { %452 = dma.done.wait (!%p366_p2), %s283_s19, 128  }
 0x110   : > { %454 = vsyncadd (!%p366_p2), %s283_s19, 4294967168  ;;  %p13_p3 = scmp.ge.s32.totalorder %s520_s18, 4   ;;  %s616_s12 = smov %s461_s13 }
 0x111   : > { %s617_s13 = smov %s465_s14  ;;  %s618_s14 = smov %s531_s21 }
 0x112   : > { %s619_s15 = smov %s520_s18  ;;  %15 = sbr.rel (!%p13_p3) target bundleno = 3 (0x3), region = 67 }
 0x119   :  { %288 = vsyncpa [#allocation3], 1 }
 0x11a   :  { %290 = vsyncpa [#allocation3 + $0x1], 1 }

</bundles_post_ra>
